<compile_context>
chip_gen: v7x
topology: tpu7x:2x2x1
jax: 0.10.0
libtpu: 0.0.40
codegen_flags: <defaults>
</compile_context>

<pallas_src>
import functools

import jax
import jax.numpy as jnp
from jax.experimental import pallas as pl
from jax.experimental.pallas import tpu as pltpu


def _round_up(x, m):
    return ((x + m - 1) // m) * m


def _cdiv(a, b):
    return (a + b - 1) // b


@functools.lru_cache(maxsize=None)
def _vmem_limit_bytes():
    """Generation-aware VMEM limit: ~5/8 of physical VMEM (v5e/v6e 128 MiB ->
    80 MiB, v7x 64 MiB/TC -> 40 MiB), never below the 32 MiB scoped default."""
    cap = 128 * 1024 * 1024
    try:
        cap = int(getattr(pltpu.get_tpu_info(), "vmem_capacity_bytes", cap))
    except Exception:
        pass
    return int(min(max(cap * 5 // 8, 32 * 1024 * 1024), 96 * 1024 * 1024))


def _tile_budget_bytes():
    return max(_vmem_limit_bytes() - 8 * 1024 * 1024, 16 * 1024 * 1024)


# ----------------------------------------------------------------------------
# Small-C path (C <= 64): classes folded into lanes, 128-lane dense everywhere.
# ----------------------------------------------------------------------------
def _folded_kernel(c_pad, weighted):
    g = 128 // c_pad
    shift = c_pad.bit_length() - 1          # log2(c_pad), c_pad is a power of 2

    def kernel(*refs):
        if weighted:
            lab_ref, yp_ref, w_ref, out_ref = refs
        else:
            lab_ref, yp_ref, out_ref = refs
        tr = yp_ref.shape[0]

        lane = jax.lax.broadcasted_iota(jnp.int32, (tr, 128), 1)
        cls_in_grp = (lane & (c_pad - 1)).astype(jnp.float32)

        # Expand per-sample labels to every lane of their group with a tiny
        # constant matmul: E[j, l] = 1 iff lane l belongs to group j.
        # Labels are small ints (< 64) -> exact at any MXU precision.
        e_grp = jax.lax.broadcasted_iota(jnp.int32, (g, 128), 1) >> shift
        e_row = jax.lax.broadcasted_iota(jnp.int32, (g, 128), 0)
        exp_mat = (e_grp == e_row).astype(jnp.float32)
        lab_lane = jnp.dot(lab_ref[...].astype(jnp.float32), exp_mat,
                           preferred_element_type=jnp.float32)        # (tr, 128)

        sel = cls_in_grp == lab_lane                                   # exact small ints
        logp = yp_ref[...]                                             # native dtype
        if weighted:
            vals = jnp.where(sel, w_ref[...] * logp.astype(jnp.float32),
                             jnp.float32(0))
        else:
            # keep bf16 bf16: exactly one non-zero per group, so the extraction
            # below is exact and only the result is promoted to f32.
            vals = jnp.where(sel, logp, jnp.zeros_like(logp))

        # Per-group extraction: S[l, j] = 1 iff lane l belongs to group j.
        s_grp = jax.lax.broadcasted_iota(jnp.int32, (128, g), 0) >> shift
        s_col = jax.lax.broadcasted_iota(jnp.int32, (128, g), 1)
        sum_mat = (s_grp == s_col).astype(vals.dtype)
        prec = (jax.lax.Precision.HIGHEST
                if vals.dtype == jnp.float32 else jax.lax.Precision.DEFAULT)
        out_ref[...] = -jnp.dot(vals, sum_mat,
                                preferred_element_type=jnp.float32,
                                precision=prec)                         # (tr, g) f32

    return kernel


@functools.lru_cache(maxsize=None)
def _build_folded_call(r_pad, tr, c_pad, weighted):
    g = 128 // c_pad
    in_specs = [
        pl.BlockSpec((tr, g), lambda i: (i, 0)),       # labels: one int32 / sample
        pl.BlockSpec((tr, 128), lambda i: (i, 0)),     # folded y_pred, native dtype
    ]
    if weighted:
        in_specs.append(pl.BlockSpec((1, 128), lambda i: (0, 0)))  # tiled weights
    return pl.pallas_call(
        _folded_kernel(c_pad, weighted),
        out_shape=jax.ShapeDtypeStruct((r_pad, g), jnp.float32),
        grid_spec=pltpu.PrefetchScalarGridSpec(
            num_scalar_prefetch=0,
            grid=(r_pad // tr,),
            in_specs=in_specs,
            out_specs=pl.BlockSpec((tr, g), lambda i: (i, 0)),
        ),
        compiler_params=pltpu.CompilerParams(
            dimension_semantics=("parallel",),
            vmem_limit_bytes=_vmem_limit_bytes(),
        ),
    )


def _masked_nll_costs_folded(y_true, y_pred, balance_weight):
    n, c = y_pred.shape
    c_pad = max(int(pl.next_power_of_2(int(c))), 1)    # divides 128 (c <= 64)
    g = 128 // c_pad
    itemsize = jnp.dtype(y_pred.dtype).itemsize

    # Row tile from actual per-step VMEM bytes (double-buffered y_pred + the
    # lane-padded labels and output blocks), capped at 8192 folded rows.
    per_row = 2 * (128 * itemsize + 512 + 512)
    tr = max(8, min((_tile_budget_bytes() // per_row) // 8 * 8, 8192))
    r_need = _cdiv(n, g)
    r8 = _round_up(r_need, 8)
    if tr >= r8:
        # Whole problem fits in one tile; keep >=2 grid steps when there is
        # enough work so both v7x TensorCores are used.
        tr = r8 if r8 < 16 else _round_up(_cdiv(r8, 2), 8)
    r_pad = _round_up(r_need, tr)
    n_full = r_pad * g

    yp = y_pred
    if c_pad != c:
        yp = jnp.pad(yp, ((0, 0), (0, c_pad - c)))
    if n_full != n:
        yp = jnp.pad(yp, ((0, n_full - n), (0, 0)))
    yp = yp.reshape(r_pad, 128)                         # free row-major fold

    yt = y_true.reshape(-1).astype(jnp.int32)
    if n_full != n:
        yt = jnp.pad(yt, (0, n_full - n))
    yt = yt.reshape(r_pad, g)

    weighted = balance_weight is not None
    args = [yt, yp]
    if weighted:
        w = jnp.asarray(balance_weight).reshape(c).astype(jnp.float32)
        if c_pad != c:
            w = jnp.pad(w, (0, c_pad - c))
        args.append(jnp.tile(w, g).reshape(1, 128))

    out = _build_folded_call(r_pad, tr, c_pad, weighted)(*args)   # (r_pad, g) f32
    return out.reshape(-1)[:n]


# ----------------------------------------------------------------------------
# Large-C path (C > 64): class-chunked grid with a VMEM accumulator.
# ----------------------------------------------------------------------------
def _chunked_kernel(weighted):
    def kernel(*refs):
        if weighted:
            lab_ref, yp_ref, w_ref, out_ref, acc_ref = refs
        else:
            lab_ref, yp_ref, out_ref, acc_ref = refs
        tr, ck = yp_ref.shape
        k = pl.program_id(1)

        @pl.when(k == 0)
        def _():
            acc_ref[...] = jnp.zeros_like(acc_ref)

        cls = jax.lax.broadcasted_iota(jnp.int32, (tr, ck), 1) + k * ck
        sel = cls == lab_ref[...]                      # (tr,1) broadcast over lanes
        logp = yp_ref[...].astype(jnp.float32)
        if weighted:
            vals = jnp.where(sel, w_ref[...] * logp, jnp.float32(0))
        else:
            vals = jnp.where(sel, logp, jnp.float32(0))
        acc_ref[...] += jnp.sum(vals, axis=1, keepdims=True)

        @pl.when(k == pl.num_programs(1) - 1)
        def _():
            out_ref[...] = -acc_ref[...]

    return kernel


@functools.lru_cache(maxsize=None)
def _build_chunked_call(n_pad, c_pad, tr, ck, weighted):
    in_specs = [
        pl.BlockSpec((tr, 1), lambda i, k: (i, 0)),    # labels
        pl.BlockSpec((tr, ck), lambda i, k: (i, k)),   # y_pred class chunk
    ]
    if weighted:
        in_specs.append(pl.BlockSpec((1, ck), lambda i, k: (0, k)))
    return pl.pallas_call(
        _chunked_kernel(weighted),
        out_shape=jax.ShapeDtypeStruct((n_pad, 1), jnp.float32),
        grid_spec=pltpu.PrefetchScalarGridSpec(
            num_scalar_prefetch=0,
            grid=(n_pad // tr, c_pad // ck),
            in_specs=in_specs,
            out_specs=pl.BlockSpec((tr, 1), lambda i, k: (i, 0)),
            scratch_shapes=[pltpu.VMEM((tr, 1), jnp.float32)],
        ),
        compiler_params=pltpu.CompilerParams(
            dimension_semantics=("parallel", "arbitrary"),
            vmem_limit_bytes=_vmem_limit_bytes(),
        ),
    )


def _masked_nll_costs_chunked(y_true, y_pred, balance_weight):
    n, c = y_pred.shape
    itemsize = jnp.dtype(y_pred.dtype).itemsize
    c128 = _round_up(c, 128)
    nck = _cdiv(c128, 1024)                             # chunks of <= 1024 classes
    ck = _round_up(_cdiv(c128, nck), 128)
    c_pad = ck * nck

    per_row = 2 * ck * itemsize + 2 * 512 + 2 * 512 + 512   # y_pred, labels, out (dbl) + acc
    tr = max(8, min((_tile_budget_bytes() // per_row) // 8 * 8, 2048))
    n8 = _round_up(n, 8)
    if tr >= n8:
        tr = n8 if (n8 < 16 or nck >= 2) else _round_up(_cdiv(n8, 2), 8)
    n_pad = _round_up(n, tr)

    yp = y_pred
    if c_pad != c:
        yp = jnp.pad(yp, ((0, 0), (0, c_pad - c)))
    if n_pad != n:
        yp = jnp.pad(yp, ((0, n_pad - n), (0, 0)))

    yt = y_true.reshape(-1).astype(jnp.int32)
    if n_pad != n:
        yt = jnp.pad(yt, (0, n_pad - n))
    yt = yt.reshape(n_pad, 1)

    weighted = balance_weight is not None
    args = [yt, yp]
    if weighted:
        w = jnp.asarray(balance_weight).reshape(c).astype(jnp.float32)
        if c_pad != c:
            w = jnp.pad(w, (0, c_pad - c))
        args.append(w.reshape(1, c_pad))

    out = _build_chunked_call(n_pad, c_pad, tr, ck, weighted)(*args)   # (n_pad,1)
    return out.reshape(-1)[:n]


# ----------------------------------------------------------------------------
# Public API matching the PyTorch module's forward.
# ----------------------------------------------------------------------------
def masked_nll_costs(y_true, y_pred, balance_weight=None):
    """Per-sample NLL costs, shape (N, 1) f32 (pre masked_select).
    Labels are assumed in-range [0, C), as in the reference module."""
    n, c = y_pred.shape
    if c <= 64:
        flat = _masked_nll_costs_folded(y_true, y_pred, balance_weight)
    else:
        flat = _masked_nll_costs_chunked(y_true, y_pred, balance_weight)
    return flat.reshape(n, 1)


def masked_nll_loss(y_true, y_pred, sw, balance_weight=None):
    """Forward pass of MaskedNLLLoss.

    torch.masked_select returns a dynamically-shaped tensor; JAX needs static
    shapes, so we return (packed_costs, num_valid): the costs selected by `sw`
    compacted (order-preserving) to the front of an N-sized buffer, zeros after.
    """
    costs = masked_nll_costs(y_true, y_pred, balance_weight).reshape(-1)
    mask = sw.reshape(-1).astype(bool)
    n = costs.shape[0]
    count = jnp.sum(mask.astype(jnp.int32))
    # TODO(synk): this O(N) cumsum+scatter compaction runs in XLA outside the
    # kernel; for very large N it could be fused into the kernel with
    # scalar-prefetched per-tile offsets (PrefetchScalarGridSpec) instead.
    dest = jnp.where(mask, jnp.cumsum(mask.astype(jnp.int32)) - 1, n)
    packed = jnp.zeros((n,), costs.dtype).at[dest].set(costs, mode="drop")
    return packed, count


if __name__ == "__main__":
    key = jax.random.PRNGKey(0)
    k1, k2, k3, k4, k5, k6 = jax.random.split(key, 6)

    # ---- small-C (lane-folded) path: N=16 samples, C=4 classes, weighted ----
    N, C = 16, 4
    y_pred = jax.nn.log_softmax(jax.random.normal(k1, (N, C), jnp.float32), -1)
    y_true = jax.random.randint(k2, (N,), 0, C, jnp.int32)
    sw = (jax.random.uniform(k3, (N, 1)) > 0.5).astype(jnp.uint8)
    bw = jnp.linspace(0.5, 2.0, C, dtype=jnp.float32)

    packed, count = masked_nll_loss(y_true, y_pred, sw, bw)
    jax.block_until_ready(packed)
    jax.block_until_ready(count)

    ref = -(bw[y_true] * y_pred[jnp.arange(N), y_true])
    sel = sw.reshape(-1).astype(bool)
    ref_sel = ref[sel]
    nv = int(count)
    assert nv == int(ref_sel.shape[0])
    assert jnp.allclose(packed[:nv], ref_sel, atol=1e-5, rtol=1e-5)
    assert bool(jnp.all(packed[nv:] == 0.0))

    # ---- small-C, unweighted, bf16 on the wire ------------------------------
    y_pred_bf16 = y_pred.astype(jnp.bfloat16)
    packed_u, count_u = masked_nll_loss(y_true, y_pred_bf16, sw, None)
    jax.block_until_ready(packed_u)
    ref_u = -(y_pred_bf16.astype(jnp.float32)[jnp.arange(N), y_true])
    ref_u_sel = ref_u[sel]
    nv_u = int(count_u)
    assert nv_u == int(ref_u_sel.shape[0])
    assert jnp.allclose(packed_u[:nv_u], ref_u_sel, atol=1e-5, rtol=1e-5)

    # ---- large-C (class-chunked) path: exercises the accumulator grid axis --
    N2, C2 = 24, 1300
    y_pred2 = jax.nn.log_softmax(jax.random.normal(k4, (N2, C2), jnp.float32), -1)
    y_true2 = jax.random.randint(k5, (N2,), 0, C2, jnp.int32)
    sw2 = (jax.random.uniform(k6, (N2, 1)) > 0.5).astype(jnp.uint8)
    bw2 = jnp.linspace(0.2, 3.0, C2, dtype=jnp.float32)

    packed2, count2 = masked_nll_loss(y_true2, y_pred2, sw2, bw2)
    jax.block_until_ready(packed2)
    ref2 = -(bw2[y_true2] * y_pred2[jnp.arange(N2), y_true2])
    sel2 = sw2.reshape(-1).astype(bool)
    ref2_sel = ref2[sel2]
    nv2 = int(count2)
    assert nv2 == int(ref2_sel.shape[0])
    assert jnp.allclose(packed2[:nv2], ref2_sel, atol=1e-5, rtol=1e-5)

    print("KERNEL_OK")
</pallas_src>

<mosaic_0001>
module attributes {stable_mosaic.version = 11 : i64} {
  func.func @kernel(%arg0: i32, %arg1: memref<8x32xi32, #tpu.memory_space<vmem>>, %arg2: memref<8x128xf32, #tpu.memory_space<vmem>>, %arg3: memref<1x128xf32, #tpu.memory_space<vmem>>, %arg4: memref<8x32xf32, #tpu.memory_space<vmem>>) attributes {dimension_semantics = [#tpu.dimension_semantics<parallel>], iteration_bounds = array<i64: 1>, scalar_prefetch = 0 : i64, scratch_operands = 0 : i64, tpu.core_type = #tpu.core_type<tc>, window_params = [{transform_indices = @transform_0, window_bounds = array<i64: 8, 32>}, {transform_indices = @transform_1, window_bounds = array<i64: 8, 128>}, {pipeline_mode = #tpu.pipeline_mode<synchronous>, transform_indices = @transform_2, window_bounds = array<i64: 1, 128>}, {transform_indices = @transform_3, window_bounds = array<i64: 8, 32>}]} {
    %0 = tpu.iota {dimensions = array<i32: 1>} : vector<8x128xi32>
    %c3_i32 = arith.constant 3 : i32
    %1 = vector.broadcast %c3_i32 : i32 to vector<8x128xi32>
    %2 = arith.andi %0, %1 : vector<8x128xi32>
    %3 = arith.sitofp %2 : vector<8x128xi32> to vector<8x128xf32>
    %4 = tpu.iota {dimensions = array<i32: 1>} : vector<32x128xi32>
    %c2_i32 = arith.constant 2 : i32
    %5 = vector.broadcast %c2_i32 : i32 to vector<32x128xi32>
    %6 = arith.shrsi %4, %5 : vector<32x128xi32>
    %7 = tpu.iota {dimensions = array<i32: 0>} : vector<32x128xi32>
    %8 = arith.cmpi eq, %6, %7 : vector<32x128xi32>
    %9 = arith.extui %8 : vector<32x128xi1> to vector<32x128xi32>
    %10 = arith.sitofp %9 : vector<32x128xi32> to vector<32x128xf32>
    %c0 = arith.constant 0 : index
    %c0_0 = arith.constant 0 : index
    %11 = vector.load %arg1[%c0, %c0_0] : memref<8x32xi32, #tpu.memory_space<vmem>>, vector<8x32xi32>
    %12 = arith.sitofp %11 : vector<8x32xi32> to vector<8x32xf32>
    %cst = arith.constant dense<0.000000e+00> : vector<8x128xf32>
    %13 = tpu.matmul %12, %10, %cst {dimension_numbers = #tpu.dot_dimension_numbers<[1], [0], [0], [1], [0, 0, 1, 1], [], []>} : vector<8x32xf32>, vector<32x128xf32>, vector<8x128xf32> -> vector<8x128xf32>
    %14 = arith.cmpf oeq, %3, %13 : vector<8x128xf32>
    %c0_1 = arith.constant 0 : index
    %c0_2 = arith.constant 0 : index
    %15 = vector.load %arg2[%c0_1, %c0_2] : memref<8x128xf32, #tpu.memory_space<vmem>>, vector<8x128xf32>
    %c0_3 = arith.constant 0 : index
    %c0_4 = arith.constant 0 : index
    %16 = vector.load %arg3[%c0_3, %c0_4] : memref<1x128xf32, #tpu.memory_space<vmem>>, vector<1x128xf32>
    %17 = vector.broadcast %16 : vector<1x128xf32> to vector<8x128xf32>
    %18 = arith.mulf %17, %15 : vector<8x128xf32>
    %cst_5 = arith.constant 0.000000e+00 : f32
    %19 = vector.broadcast %cst_5 : f32 to vector<8x128xf32>
    %20 = arith.select %14, %18, %19 : vector<8x128xi1>, vector<8x128xf32>
    %21 = tpu.iota {dimensions = array<i32: 0>} : vector<128x32xi32>
    %c2_i32_6 = arith.constant 2 : i32
    %22 = vector.broadcast %c2_i32_6 : i32 to vector<128x32xi32>
    %23 = arith.shrsi %21, %22 : vector<128x32xi32>
    %24 = tpu.iota {dimensions = array<i32: 1>} : vector<128x32xi32>
    %25 = arith.cmpi eq, %23, %24 : vector<128x32xi32>
    %26 = arith.extui %25 : vector<128x32xi1> to vector<128x32xi32>
    %27 = arith.sitofp %26 : vector<128x32xi32> to vector<128x32xf32>
    %cst_7 = arith.constant dense<0.000000e+00> : vector<8x32xf32>
    %28 = tpu.matmul %20, %27, %cst_7 {dimension_numbers = #tpu.dot_dimension_numbers<[1], [0], [0], [1], [0, 0, 1, 1], [], []>, precision = #tpu.contract_precision<fp32>} : vector<8x128xf32>, vector<128x32xf32>, vector<8x32xf32> -> vector<8x32xf32>
    %cst_8 = arith.constant 0.000000e+00 : f32
    %29 = vector.broadcast %cst_8 : f32 to vector<8x32xf32>
    %30 = arith.subf %29, %28 : vector<8x32xf32>
    %c0_9 = arith.constant 0 : index
    %c0_10 = arith.constant 0 : index
    %31 = vector.load %arg4[%c0_9, %c0_10] : memref<8x32xf32, #tpu.memory_space<vmem>>, vector<8x32xf32>
    tpu.vector_store %arg4[%c0_9, %c0_10], %30 {strides = array<i32>} : memref<8x32xf32, #tpu.memory_space<vmem>>, vector<8x32xf32>,
    return
  }
  func.func @transform_0(%arg0: i32) -> (i32, i32) {
    %c0_i32 = arith.constant 0 : i32
    %c0_i32_0 = arith.constant 0 : i32
    return %arg0, %c0_i32 : i32, i32
  }
  func.func @transform_1(%arg0: i32) -> (i32, i32) {
    %c0_i32 = arith.constant 0 : i32
    %c0_i32_0 = arith.constant 0 : i32
    return %arg0, %c0_i32 : i32, i32
  }
  func.func @transform_2(%arg0: i32) -> (i32, i32) {
    %c0_i32 = arith.constant 0 : i32
    %c0_i32_0 = arith.constant 0 : i32
    %c0_i32_1 = arith.constant 0 : i32
    return %c0_i32, %c0_i32_0 : i32, i32
  }
  func.func @transform_3(%arg0: i32) -> (i32, i32) {
    %c0_i32 = arith.constant 0 : i32
    %c0_i32_0 = arith.constant 0 : i32
    return %arg0, %c0_i32 : i32, i32
  }
}

</mosaic_0001>

<bundles_post_ra>
// kernel: tpu_custom_call.1
= control target key start
LH: loop header
LB: loop body
LE: loop exit
PB: predicated region body
PF: predicated region fallthrough
CT: control target
= control target key end

     0   :  { %8 = vsyncpa [#allocation3], 0  ;;  %s2133_s0 = inlined_call_operand.hbm [shape: s32[8,32], index: 0, kind: input, shape index: {}]   ;;  %s2134_s1 = inlined_call_operand.hbm [shape: f32[8,128], index: 1, kind: input, shape index: {}]   ;;  %s2135_s2 = inlined_call_operand.hbm [shape: f32[1,128], index: 2, kind: input, shape index: {}]   ;;  %s2136_s3 = inlined_call_operand.hbm [shape: f32[8,32], index: 3, kind: output, shape index: {}]  }
   0x1   :  { %9 = vsyncpa [#allocation6], 0 }
   0x2   :  { %10 = vsyncpa [#allocation4], 0  ;;  %s1557_s12 = smov [#allocation5]   ;;  %s1558_s14 = smov [#allocation2]  }
   0x3   :  { %s27_s13 = sshll.u32 %s1557_s12, 4  ;;  %s17_s15 = sshll.u32 %s1558_s14, 4  ;;  %s28_s13 = int_to_ptr.vmem [resolvable:$true] %s27_s13  ;;  %s18_s15 = int_to_ptr.vmem [resolvable:$true] %s17_s15 }
   0x4   :  { %s1463_s18 = scalar_lea.hbm %s2134_s1, 128 }
   0x5   :  { %p1464_p0 = scmp.ne.s32.totalorder %s2134_s1, %s1463_s18  ;;  %p1467_p1 = scmp.lt.u32.totalorder %s1463_s18, %s2134_s1 }
   0x7   :  { %p1469_p2 = pnand %p1467_p1, %p1464_p0 }
   0x9   :  { %1472 = shalt.err (!%p1469_p2)
}
   0xa   :  { %s1473_s23 = scalar_lea.vmem %s28_s13, 128  ;;  %p1478_p4 = scmp.lt.s32.totalorder %s28_s13, %s28_s13 }
   0xb   :  { %p1474_p3 = scmp.ne.s32.totalorder %s28_s13, %s1473_s23  ;;  %p1479_p5 = scmp.lt.s32.totalorder %s1473_s23, %s1473_s23 }
   0xd   :  { %p1480_p6 = por %p1479_p5, %p1478_p4 }
   0xf   :  { %p1481_p7 = pnand %p1480_p6, %p1474_p3 }
  0x11   :  { %1484 = shalt.err (!%p1481_p7)
}
  0x12   :  { %30 = dma.hbm_to_vmem [thread:$0]  %s2134_s1, 128, %s28_s13, [#allocation6]  }
  0x13   :  { %s1485_s28 = scalar_lea.hbm %s2133_s0, 128 }
  0x14   :  { %p1486_p8 = scmp.ne.s32.totalorder %s2133_s0, %s1485_s28  ;;  %p1489_p9 = scmp.lt.u32.totalorder %s1485_s28, %s2133_s0 }
  0x16   :  { %p1491_p10 = pnand %p1489_p9, %p1486_p8 }
  0x18   :  { %1494 = shalt.err (!%p1491_p10)
}
  0x19   :  { %s1495_s6 = scalar_lea.vmem %s18_s15, 128  ;;  %p1500_p12 = scmp.lt.s32.totalorder %s18_s15, %s18_s15 }
  0x1a   :  { %p1496_p11 = scmp.ne.s32.totalorder %s18_s15, %s1495_s6  ;;  %p1501_p13 = scmp.lt.s32.totalorder %s1495_s6, %s1495_s6 }
  0x1c   :  { %p1502_p0 = por %p1501_p13, %p1500_p12 }
  0x1e   :  { %p1503_p1 = pnand %p1502_p0, %p1496_p11 }
  0x20   :  { %1506 = shalt.err (!%p1503_p1)
}
  0x21   :  { %20 = dma.hbm_to_vmem [thread:$0]  %s2133_s0, 128, %s18_s15, [#allocation3]  }
  0x22   :  { %s1559_s8 = smov [#allocation7]   ;;  %s1507_s12 = scalar_lea.hbm %s2135_s2, 16 }
  0x23   :  { %s37_s9 = sshll.u32 %s1559_s8, 4  ;;  %p1508_p2 = scmp.ne.s32.totalorder %s2135_s2, %s1507_s12  ;;  %s38_s9 = int_to_ptr.vmem [resolvable:$true] %s37_s9 }
  0x24   :  { %p1511_p3 = scmp.lt.u32.totalorder %s1507_s12, %s2135_s2 }
  0x26   :  { %p1513_p4 = pnand %p1511_p3, %p1508_p2 }
  0x28   :  { %1516 = shalt.err (!%p1513_p4)
}
  0x29   :  { %s1517_s18 = scalar_lea.vmem %s38_s9, 16  ;;  %s1521_s0 = scalar_lea.vmem %s38_s9, 32 }
  0x2a   :  { %p1518_p5 = scmp.ne.s32.totalorder %s38_s9, %s1517_s18  ;;  %p1522_p6 = scmp.lt.s32.totalorder %s38_s9, %s38_s9 }
  0x2b   :  { %p1523_p7 = scmp.lt.s32.totalorder %s1521_s0, %s1517_s18 }
  0x2d   :  { %p1524_p8 = por %p1523_p7, %p1522_p6 }
  0x2f   :  { %p1525_p9 = pnand %p1524_p8, %p1518_p5 }
  0x31   :  { %1528 = shalt.err (!%p1525_p9)
}
  0x32   :  { %40 = dma.hbm_to_vmem [thread:$0]  %s2135_s2, 16, %s38_s9, [#allocation6]  }
  0x33   :  { %1551 = dma.done.wait [#allocation3], 128  }
  0x34   :  { %1552 = vsyncadd [#allocation3], 4294967168 }
  0x35   :  { %1553 = dma.done.wait [#allocation6], 144  }
  0x36   :  { %1554 = vsyncadd [#allocation6], 4294967152  ;;  %v50_v0 = vlaneseq  ;;  %v1560_v1 = vmov 0.0|0.0   ;;  %vm2138_vm0 = vmmov 0   ;;  %v1562_v4 = vmov 0.0   ;;  %v72_v17 = vld [vmem:[#allocation2] sm:$0xff] }
  0x37   :  { %1296 = vmatprep.subr.bf16.mxu0 %v1560_v1  ;;  %1374 = vmatprep.subr.bf16.mxu1 %v1560_v1  ;;  %v1563_v16 = vmov 1.0|1.0   ;;  %v73_v25 = vcvt.s32.f32 %v72_v17  ;;  %vm2137_vm12 = vcmask 261120   ;;  %v2155_v26 = vmov 0  ;;  %s1564_s2 = smov [#allocation8]  }
  0x38   :  { %v1623_v2 = vand.u32 127, %v50_v0  ;;  %v1625_v3 = vshrl.u32 %v50_v0, 7  ;;  %1083 = vmatprep.mubr.msk.f32.mxu0 %vm2138_vm0, %v1562_v4  ;;  %1223 = vmatprep.mubr.msk.f32.mxu1 %vm2138_vm0, %v1562_v4  ;;  %v2161_v34 = vmov 0  ;;  %v2173_v46 = vmov 0  ;;  %s884_s20 = sshll.u32 %s1564_s2, 4  ;;  %s885_s20 = int_to_ptr.vmem [resolvable:$true] %s884_s20 }
  0x39   :  { %v2179_v49 = vmov 0  ;;  %v2185_v0 = vmov 0  ;;  %s1529_s21 = scalar_lea.vmem %s885_s20, 128  ;;  %p1534_p11 = scmp.lt.s32.totalorder %s885_s20, %s885_s20 }
  0x3a   :  { %v54_v5 = vshra.s32 %v1623_v2, 2  ;;  %v57_v6 = vadd.s32 8, %v1625_v3  ;;  %v58_v7 = vadd.s32 16, %v1625_v3  ;;  %v59_v8 = vadd.s32 24, %v1625_v3  ;;  %p1530_p10 = scmp.ne.s32.totalorder %s885_s20, %s1529_s21  ;;  %p1535_p12 = scmp.lt.s32.totalorder %s1529_s21, %s1529_s21 }
  0x3b   :  { %v171_v9 = vshra.s32 %v1625_v3, 2  ;;  %v159_v10 = vadd.s32 32, %v1625_v3  ;;  %v160_v11 = vadd.s32 40, %v1625_v3  ;;  %v161_v19 = vadd.s32 48, %v1625_v3 }
  0x3c   :  { %vm60_vm1 = vcmp.eq.s32.totalorder %v54_v5, %v1625_v3  ;;  %vm61_vm2 = vcmp.eq.s32.totalorder %v54_v5, %v57_v6  ;;  %vm62_vm3 = vcmp.eq.s32.totalorder %v54_v5, %v58_v7  ;;  %vm63_vm4 = vcmp.eq.s32.totalorder %v54_v5, %v59_v8  ;;  %p1536_p13 = por %p1535_p12, %p1534_p11 }
  0x3d   :  { %vm1297_vm5 = vmpackc.low %vm61_vm2, %vm60_vm1  ;;  %v172_v12 = vshra.s32 %v57_v6, 2  ;;  %vm1640_vm6 = vcmp.eq.s32.totalorder %v171_v9, %v1623_v2  ;;  %v173_v14 = vshra.s32 %v58_v7, 2  ;;  %v174_v15 = vshra.s32 %v59_v8, 2 }
  0x3e   :  { %1298 = vmatpush3.bf16.msk.msra.mxu0 %vm1297_vm5, %v1563_v16  ;;  %v175_v18 = vshra.s32 %v159_v10, 2  ;;  %vm1300_vm7 = vmpackc.low %vm63_vm4, %vm62_vm3  ;;  %v176_v23 = vshra.s32 %v160_v11, 2  ;;  %v162_v27 = vadd.s32 56, %v1625_v3  ;;  %v177_v28 = vshra.s32 %v161_v19, 2  ;;  %p1537_p0 = pnand %p1536_p13, %p1530_p10 }
  0x3f   :  { %1299 = vmatprep.subr.bf16.mxu0 %v1560_v1  ;;  %vm1648_vm8 = vcmp.eq.s32.totalorder %v172_v12, %v1623_v2  ;;  %vm1653_vm9 = vcmp.eq.s32.totalorder %v173_v14, %v1623_v2  ;;  %vm1658_vm10 = vcmp.eq.s32.totalorder %v174_v15, %v1623_v2  ;;  %v163_v32 = vadd.s32 64, %v1625_v3 }
  0x40   :  { %vm1666_vm11 = vmpackc.low %vm1648_vm8, %vm1640_vm6  ;;  %vm1686_vm14 = vcmp.eq.s32.totalorder %v175_v18, %v1623_v2  ;;  %vm1691_vm15 = vcmp.eq.s32.totalorder %v176_v23, %v1623_v2  ;;  %v178_v31 = vshra.s32 %v162_v27, 2  ;;  %v164_v33 = vadd.s32 72, %v1625_v3 }
  0x41   :  { %1376 = vmatpush3.bf16.msk.msra.mxu1 %vm1666_vm11, %v1563_v16  ;;  %vm1679_vm13 = vmpackc.low %vm1658_vm10, %vm1653_vm9  ;;  %vm1714_vm2 = vcmp.eq.s32.totalorder %v177_v28, %v1623_v2  ;;  %v179_v37 = vshra.s32 %v163_v32, 2  ;;  %v165_v39 = vadd.s32 80, %v1625_v3  ;;  %v166_v40 = vadd.s32 88, %v1625_v3 }
  0x42   :  { %1301 = vmatpush3.bf16.msk.msra.mxu0 %vm1300_vm7, %v1563_v16  ;;  %1377 = vmatprep.subr.bf16.mxu1 %v1560_v1  ;;  %v2156_v26 = vsel %vm1679_vm13, 4294967295, %v2155_v26  ;;  %vm1709_vm1 = vmpackc.low %vm1691_vm15, %vm1686_vm14  ;;  %vm1719_vm3 = vcmp.eq.s32.totalorder %v178_v31, %v1623_v2  ;;  %v180_v38 = vshra.s32 %v164_v33, 2  ;;  %v904_v50 = vsel %vm1640_vm6, 1.0, %v1562_v4 }
  0x43   :  { %1302 = vmatprep.subr.bf16.mxu0 %v1560_v1  ;;  %v2162_v34 = vsel %vm1709_vm1, 4294967295, %v2161_v34  ;;  %vm1739_vm4 = vmpackc.low %vm1719_vm3, %vm1714_vm2  ;;  %vm1745_vm5 = vcmp.eq.s32.totalorder %v179_v37, %v1623_v2  ;;  %v181_v44 = vshra.s32 %v165_v39, 2  ;;  %v182_v45 = vshra.s32 %v166_v40, 2 }
  0x44   :  { %vm1750_vm7 = vcmp.eq.s32.totalorder %v180_v38, %v1623_v2  ;;  %v905_v51 = vsel %vm1648_vm8, 1.0, %v1562_v4  ;;  %v167_v52 = vadd.s32 96, %v1625_v3  ;;  %v168_v53 = vadd.s32 104, %v1625_v3 }
  0x45   :  { %1084 = vmatmul.mubr.msk.f32.vlgmr.msra.gmra.mrb[0].mxu0 %vm2137_vm12, %v73_v25  ;;  %1379 = vmatpush3.bf16.msk.msra.mxu1 %vm1679_vm13, %v1563_v16  ;;  %vm1765_vm12 = vmpackc.low %vm1750_vm7, %vm1745_vm5  ;;  %v1816_v54 = vsub.f32 %v904_v50, %v904_v50  ;;  %v1818_v55 = vsub.f32 %v905_v51, %v905_v51  ;;  %v169_v60 = vadd.s32 112, %v1625_v3  ;;  %v170_v61 = vadd.s32 120, %v1625_v3 }
  0x46   :  { %1304 = vmatpush3.bf16.msk.msra.mxu0 %vm1666_vm11, %v1563_v16  ;;  %1380 = vmatprep.subr.bf16.mxu1 %v1560_v1  ;;  %v2174_v46 = vsel %vm1765_vm12, 4294967295, %v2173_v46  ;;  %v183_v56 = vshra.s32 %v167_v52, 2  ;;  %v184_v57 = vshra.s32 %v168_v53, 2  ;;  %v906_v6 = vsel %vm1653_vm9, 1.0, %v1562_v4 }
  0x47   :  { %1305 = vmatprep.subr.bf16.mxu0 %v1560_v1  ;;  %1118 = vmatprep.mubr.msk.f32.mxu0 %vm2138_vm0, %v1562_v4  ;;  %vm1771_vm0 = vcmp.eq.s32.totalorder %v181_v44, %v1623_v2  ;;  %v329_v62 = vand.u32 4294901760, %v1816_v54  ;;  %v336_v63 = vand.u32 4294901760, %v1818_v55  ;;  %v185_v3 = vshra.s32 %v169_v60, 2 }
  0x48   :  { %vm1826_vm6 = vcmp.eq.s32.totalorder %v184_v57, %v1623_v2  ;;  %v186_v5 = vshra.s32 %v170_v61, 2  ;;  %v907_v7 = vsel %vm1658_vm10, 1.0, %v1562_v4  ;;  %v1882_v13 = vsub.f32 %v906_v6, %v906_v6 }
  0x49   :  { %1382 = vmatpush3.bf16.msk.msra.mxu1 %vm1709_vm1, %v1563_v16  ;;  %v330_v10 = vsub.f32 %v1816_v54, %v329_v62  ;;  %v337_v11 = vsub.f32 %v1818_v55, %v336_v63  ;;  %v1884_v14 = vsub.f32 %v907_v7, %v907_v7  ;;  %v908_v15 = vsel %vm1686_vm14, 1.0, %v1562_v4 }
  0x4a   :  { %1307 = vmatpush3.bf16.msk.msra.mxu0 %vm1679_vm13, %v1563_v16  ;;  %1383 = vmatprep.subr.bf16.mxu1 %v1560_v1  ;;  %vm1776_vm13 = vcmp.eq.s32.totalorder %v182_v45, %v1623_v2  ;;  %v909_v17 = vsel %vm1691_vm15, 1.0, %v1562_v4  ;;  %v1893_v18 = vpack.c.bf16 %v336_v63, %v329_v62  ;;  %v1896_v21 = vsub.f32 %v908_v15, %v908_v15 }
  0x4b   :  { %1308 = vmatprep.subr.bf16.mxu0 %v1560_v1  ;;  %v331_v19 = vand.u32 4294901760, %v330_v10  ;;  %v338_v20 = vand.u32 4294901760, %v337_v11  ;;  %v1898_v22 = vsub.f32 %v909_v17, %v909_v17  ;;  %v910_v23 = vsel %vm1714_vm2, 1.0, %v1562_v4 }
  0x4c   :  { %v911_v25 = vsel %vm1719_vm3, 1.0, %v1562_v4  ;;  %v343_v27 = vand.u32 4294901760, %v1882_v13  ;;  %v350_v28 = vand.u32 4294901760, %v1884_v14  ;;  %v1914_v33 = vsub.f32 %v910_v23, %v910_v23 }
  0x4d   :  { %1385 = vmatpush3.bf16.msk.msra.mxu1 %vm1739_vm4, %v1563_v16  ;;  %v1908_v29 = vpack.c.bf16 %v338_v20, %v331_v19  ;;  %v1916_v35 = vsub.f32 %v911_v25, %v911_v25  ;;  %v912_v36 = vsel %vm1745_vm5, 1.0, %v1562_v4  ;;  %v913_v37 = vsel %vm1750_vm7, 1.0, %v1562_v4 }
  0x4e   :  { %1310 = vmatpush3.bf16.msk.msra.mxu0 %vm1709_vm1, %v1563_v16  ;;  %1386 = vmatprep.subr.bf16.mxu1 %v1560_v1  ;;  %vm1791_vm1 = vmpackc.low %vm1776_vm13, %vm1771_vm0  ;;  %v1910_v30 = vpack.c.bf16 %v350_v28, %v343_v27  ;;  %v344_v31 = vsub.f32 %v1882_v13, %v343_v27  ;;  %v351_v32 = vsub.f32 %v1884_v14, %v350_v28  ;;  %v357_v40 = vand.u32 4294901760, %v1896_v21 }
  0x4f   :  { %1311 = vmatprep.subr.bf16.mxu0 %v1560_v1  ;;  %v2180_v49 = vsel %vm1791_vm1, 4294967295, %v2179_v49  ;;  %v364_v44 = vand.u32 4294901760, %v1898_v22  ;;  %v1932_v42 = vsub.f32 %v912_v36, %v912_v36  ;;  %v1934_v53 = vsub.f32 %v913_v37, %v913_v37 }
  0x50   :  { %v345_v38 = vand.u32 4294901760, %v344_v31  ;;  %v352_v39 = vand.u32 4294901760, %v351_v32  ;;  %v358_v51 = vsub.f32 %v1896_v21, %v357_v40  ;;  %v914_v43 = vsel %vm1771_vm0, 1.0, %v1562_v4 }
  0x51   :  { %1388 = vmatpush3.bf16.msk.msra.mxu1 %vm1765_vm12, %v1563_v16  ;;  %v1928_v50 = vpack.c.bf16 %v364_v44, %v357_v40  ;;  %v365_v52 = vsub.f32 %v1898_v22, %v364_v44  ;;  %v371_v61 = vand.u32 4294901760, %v1914_v33  ;;  %v378_v62 = vand.u32 4294901760, %v1916_v35 }
  0x52   :  { %1313 = vmatpush3.bf16.msk.msra.mxu0 %vm1739_vm4, %v1563_v16  ;;  %1389 = vmatprep.subr.bf16.mxu1 %v1560_v1  ;;  %v1926_v45 = vpack.c.bf16 %v352_v39, %v345_v38  ;;  %v359_v57 = vand.u32 4294901760, %v358_v51  ;;  %v1950_v47 = vsub.f32 %v914_v43, %v914_v43  ;;  %v917_v10 = vsel %vm1826_vm6, 1.0, %v1562_v4 }
  0x53   :  { %1314 = vmatprep.subr.bf16.mxu0 %v1560_v1  ;;  %v366_v60 = vand.u32 4294901760, %v365_v52  ;;  %v379_v6 = vsub.f32 %v1916_v35, %v378_v62  ;;  %v385_v17 = vand.u32 4294901760, %v1932_v42  ;;  %v392_v19 = vand.u32 4294901760, %v1934_v53 }
  0x54   :  { %v1970_v28 = vsub.f32 %v917_v10, %v917_v10  ;;  %v399_v37 = vand.u32 4294901760, %v1950_v47  ;;  %vm2193_vm10 = vmmov 0   ;;  %vm2197_vm14 = vnez %v2180_v49 }
  0x55   :  { %1391 = vmatpush3.bf16.msk.msra.mxu1 %vm1791_vm1, %v1563_v16  ;;  %v1944_v63 = vpack.c.bf16 %v366_v60, %v359_v57  ;;  %v380_v15 = vand.u32 4294901760, %v379_v6  ;;  %v1964_v23 = vpack.c.bf16 %v392_v19, %v385_v17  ;;  %v386_v25 = vsub.f32 %v1932_v42, %v385_v17 }
  0x56   :  { %1316 = vmatpush3.bf16.msk.msra.mxu0 %vm1765_vm12, %v1563_v16  ;;  %1392 = vmatprep.subr.bf16.mxu1 %v1560_v1  ;;  %vm1857_vm12 = vcmp.eq.s32.totalorder %v185_v3, %v1623_v2  ;;  %v1946_v3 = vpack.c.bf16 %v378_v62, %v371_v61  ;;  %v393_v27 = vsub.f32 %v1934_v53, %v392_v19  ;;  %v420_v57 = vand.u32 4294901760, %v1970_v28 }
  0x57   :  { %1317 = vmatprep.subr.bf16.mxu0 %v1560_v1  ;;  %v918_v59 = vsel %vm1857_vm12, 1.0, %v1562_v4  ;;  %v387_v32 = vand.u32 4294901760, %v386_v25  ;;  %v400_v44 = vsub.f32 %v1950_v47, %v399_v37 }
  0x58   :  { %v394_v36 = vand.u32 4294901760, %v393_v27  ;;  %v1986_v8 = vsub.f32 %v918_v59, %v918_v59 }
  0x59   :  { %v401_v9 = vand.u32 4294901760, %v400_v44  ;;  %v1363_v44 = vpack.c.bf16 %v1934_v53, %v1932_v42 }
  0x5a   :  { %1319 = vmatpush3.bf16.msk.msra.mxu0 %vm1791_vm1, %v1563_v16  ;;  %vm1821_vm1 = vcmp.eq.s32.totalorder %v183_v56, %v1623_v2  ;;  %v915_v56 = vsel %vm1776_vm13, 1.0, %v1562_v4  ;;  %v1980_v39 = vpack.c.bf16 %v394_v36, %v387_v32  ;;  %v427_v10 = vand.u32 4294901760, %v1986_v8 }
  0x5b   :  { %1320 = vmatprep.subr.bf16.mxu0 %v1560_v1  ;;  %vm1838_vm8 = vmpackc.low %vm1826_vm6, %vm1821_vm1  ;;  %v1952_v7 = vsub.f32 %v915_v56, %v915_v56  ;;  %v916_v48 = vsel %vm1821_vm1, 1.0, %v1562_v4  ;;  %v1351_v32 = vpack.c.bf16 %v1818_v55, %v1816_v54  ;;  %v1354_v36 = vpack.c.bf16 %v1884_v14, %v1882_v13 }
  0x5c   :  { %v2186_v0 = vsel %vm1838_vm8, 4294967295, %v2185_v0  ;;  %1394 = vmatpush3.bf16.msk.msra.mxu1 %vm1838_vm8, %v1563_v16  ;;  %v1968_v58 = vsub.f32 %v916_v48, %v916_v48  ;;  %v428_v19 = vsub.f32 %v1986_v8, %v427_v10  ;;  %v52_v55 = vand.u32 3, %v1623_v2 }
  0x5d   :  { %1395 = vmatprep.subr.bf16.mxu1 %v1560_v1  ;;  %v406_v38 = vand.u32 4294901760, %v1952_v7  ;;  %vm2196_vm13 = vnez %v2174_v46  ;;  %vm2198_vm15 = vnez %v2186_v0  ;;  %vm2199_vm1 = vcmask 261120  }
  0x5e   :  { %1322 = vmatpush3.bf16.msk.msra.mxu0 %vm1838_vm8, %v1563_v16  ;;  %vm1862_vm8 = vcmp.eq.s32.totalorder %v186_v5, %v1623_v2  ;;  %v372_v5 = vsub.f32 %v1914_v33, %v371_v61  ;;  %v413_v56 = vand.u32 4294901760, %v1968_v58  ;;  %v429_v27 = vand.u32 4294901760, %v428_v19 }
  0x5f   :  { %1323 = vmatprep.subr.bf16.mxu0 %v1560_v1  ;;  %vm1872_vm9 = vmpackc.low %vm1862_vm8, %vm1857_vm12  ;;  %v919_v31 = vsel %vm1862_vm8, 1.0, %v1562_v4  ;;  %v1982_v40 = vpack.c.bf16 %v406_v38, %v399_v37  ;;  %v407_v51 = vsub.f32 %v1952_v7, %v406_v38  ;;  %v1357_v37 = vpack.c.bf16 %v1898_v22, %v1896_v21 }
  0x60   :  { %1397 = vmatpush3.bf16.msk.msra.mxu1 %vm1872_vm9, %v1563_v16  ;;  %v373_v11 = vand.u32 4294901760, %v372_v5  ;;  %v1988_v52 = vsub.f32 %v919_v31, %v919_v31  ;;  %v1417_v61 = vpack.c.bf16 %v420_v57, %v413_v56  ;;  %v414_v62 = vsub.f32 %v1968_v58, %v413_v56  ;;  %v903_v56 = vld [vmem:[#allocation7] ss:$0 sm:$0xff] }
  0x61   :  { %1398 = vmatprep.subr.bf16.mxu1 %v1560_v1  ;;  %v408_v43 = vand.u32 4294901760, %v407_v51  ;;  %v421_v5 = vsub.f32 %v1970_v28, %v420_v57  ;;  %v1360_v38 = vpack.c.bf16 %v1916_v35, %v1914_v33  ;;  %v1366_v51 = vpack.c.bf16 %v1952_v7, %v1950_v47 }
  0x62   :  { %1325 = vmatpush3.bf16.msk.msra.mxu0 %vm1872_vm9, %v1563_v16  ;;  %v1962_v20 = vpack.c.bf16 %v380_v15, %v373_v11  ;;  %v415_v6 = vand.u32 4294901760, %v414_v62  ;;  %v434_v11 = vand.u32 4294901760, %v1988_v52  ;;  %v1372_v54 = vpack.c.bf16 %v1988_v52, %v1986_v8 }
  0x63   :  { %1326 = vmatprep.subr.bf16.mxu0 %v1560_v1  ;;  %v1342_v60 = vpack.c.bf16 %v408_v43, %v401_v9  ;;  %v422_v48 = vand.u32 4294901760, %v421_v5  ;;  %v1369_v9 = vpack.c.bf16 %v1970_v28, %v1968_v58  ;;  %v149_v43 = vld [vmem:[#allocation5] sm:$0xff]  ;;  %v53_v57 = vcvt.s32.f32 %v52_v55 }
  0x64   :  { %v1420_v17 = vpack.c.bf16 %v434_v11, %v427_v10  ;;  %v435_v25 = vsub.f32 %v1988_v52, %v434_v11  ;;  %v157_v62 = vmul.f32 %v903_v56, %v149_v43  ;;  %vm2194_vm12 = vnez %v2156_v26 }
  0x65   :  { %v1345_v15 = vpack.c.bf16 %v422_v48, %v415_v6 }
  0x66   :  { %v436_v59 = vand.u32 4294901760, %v435_v25 }
  0x68   :  { %v1348_v31 = vpack.c.bf16 %v436_v59, %v429_v27 }
 0x118   :  { %v144_v5 = vpop.f32.mrb[0].mxu0 }
 0x119   :  { %vm148_vm0 = vcmp.eq.f32.partialorder %v53_v57, %v144_v5  ;;  %v1085_v6 = vpop.f32.mrb[1].mxu0 }
 0x11a   :  { %v158_v48 = vsel %vm148_vm0, %v157_v62, 0.0 }
 0x11b   :  { %v2015_v10 = vand.u32 4294901760, %v158_v48 }
 0x11d   :  { %v2018_v11 = vsub.f32 %v158_v48, %v2015_v10 }
 0x11f   :  { %v318_v19 = vand.u32 4294901760, %v2018_v11 }
 0x121   :  { %v319_v25 = vsub.f32 %v2018_v11, %v318_v19  ;;  %1224 = vmatmul.mubr.f32.vlgmr.msra.gmra.mrb[0].mxu1 %v318_v19 }
 0x122   :  { %1400 = vmatpush3.bf16.msra.mxu1 %v1893_v18  ;;  %1258 = vmatprep.mubr.msk.f32.mxu1 %vm2193_vm10, %v1562_v4 }
 0x123   :  { %v320_v2 = vand.u32 4294901760, %v319_v25  ;;  %1401 = vmatprep.subr.bf16.mxu1 %v1560_v1 }
 0x125   :  { %1119 = vmatmul.mubr.f32.vlgmr.msra.gmra.mrb[2].mxu0 %v320_v2 }
 0x126   :  { %1328 = vmatpush3.bf16.msra.mxu0 %v1908_v29  ;;  %1403 = vmatpush3.bf16.msra.mxu1 %v1910_v30 }
 0x127   :  { %1329 = vmatprep.subr.bf16.mxu0 %v1560_v1  ;;  %1404 = vmatprep.subr.bf16.mxu1 %v1560_v1 }
 0x128   :  { %1153 = vmatprep.mubr.msk.f32.mxu0 %vm2193_vm10, %v1562_v4 }
 0x12a   :  { %1331 = vmatpush3.bf16.msra.mxu0 %v1926_v45  ;;  %1406 = vmatpush3.bf16.msra.mxu1 %v1928_v50 }
 0x12b   :  { %1332 = vmatprep.subr.bf16.mxu0 %v1560_v1  ;;  %1407 = vmatprep.subr.bf16.mxu1 %v1560_v1 }
 0x12e   :  { %1334 = vmatpush3.bf16.msra.mxu0 %v1944_v63  ;;  %1409 = vmatpush3.bf16.msra.mxu1 %v1946_v3 }
 0x12f   :  { %1335 = vmatprep.subr.bf16.mxu0 %v1560_v1  ;;  %1410 = vmatprep.subr.bf16.mxu1 %v1560_v1 }
 0x132   :  { %1337 = vmatpush3.bf16.msra.mxu0 %v1962_v20  ;;  %1412 = vmatpush3.bf16.msra.mxu1 %v1964_v23 }
 0x133   :  { %1338 = vmatprep.subr.bf16.mxu0 %v1560_v1  ;;  %1413 = vmatprep.subr.bf16.mxu1 %v1560_v1 }
 0x136   :  { %1340 = vmatpush3.bf16.msra.mxu0 %v1980_v39  ;;  %1415 = vmatpush3.bf16.msra.mxu1 %v1982_v40 }
 0x137   :  { %1341 = vmatprep.subr.bf16.mxu0 %v1560_v1  ;;  %1416 = vmatprep.subr.bf16.mxu1 %v1560_v1 }
 0x13a   :  { %1343 = vmatpush3.bf16.msra.mxu0 %v1342_v60  ;;  %1418 = vmatpush3.bf16.msra.mxu1 %v1417_v61 }
 0x13b   :  { %1344 = vmatprep.subr.bf16.mxu0 %v1560_v1  ;;  %1419 = vmatprep.subr.bf16.mxu1 %v1560_v1 }
 0x13e   :  { %1346 = vmatpush3.bf16.msra.mxu0 %v1345_v15  ;;  %1421 = vmatpush3.bf16.msra.mxu1 %v1420_v17 }
 0x13f   :  { %1347 = vmatprep.subr.bf16.mxu0 %v1560_v1  ;;  %1422 = vmatprep.subr.bf16.mxu1 %v1560_v1 }
 0x141   :  { %1259 = vmatmul.mubr.f32.vlgmr.msra.gmra.mrb[0].mxu1 %v2015_v10 }
 0x142   :  { %1349 = vmatpush3.bf16.msra.mxu0 %v1348_v31  ;;  %1424 = vmatpush3.bf16.msk.msra.mxu1 %vm1666_vm11, %v1563_v16  ;;  %vm2195_vm11 = vnez %v2162_v34 }
 0x143   :  { %1350 = vmatprep.subr.bf16.mxu0 %v1560_v1  ;;  %1425 = vmatprep.subr.bf16.mxu1 %v1560_v1 }
 0x144   :  { %1293 = vmatprep.mubr.msk.f32.mxu1 %vm2193_vm10, %v1562_v4 }
 0x145   :  { %1154 = vmatmul.mubr.f32.vlgmr.msra.gmra.mrb[2].mxu0 %v2015_v10 }
 0x146   :  { %1352 = vmatpush3.bf16.msra.mxu0 %v1351_v32  ;;  %1427 = vmatpush3.bf16.msk.msra.mxu1 %vm2194_vm12, %v1563_v16 }
 0x147   :  { %1353 = vmatprep.subr.bf16.mxu0 %v1560_v1  ;;  %1428 = vmatprep.subr.bf16.mxu1 %v1560_v1 }
 0x148   :  { %1188 = vmatprep.mubr.msk.f32.mxu0 %vm2193_vm10, %v1562_v4 }
 0x14a   :  { %1355 = vmatpush3.bf16.msra.mxu0 %v1354_v36  ;;  %1430 = vmatpush3.bf16.msk.msra.mxu1 %vm2195_vm11, %v1563_v16 }
 0x14b   :  { %1356 = vmatprep.subr.bf16.mxu0 %v1560_v1  ;;  %1431 = vmatprep.subr.bf16.mxu1 %v1560_v1 }
 0x14e   :  { %1358 = vmatpush3.bf16.msra.mxu0 %v1357_v37  ;;  %1433 = vmatpush3.bf16.msk.msra.mxu1 %vm1739_vm4, %v1563_v16 }
 0x14f   :  { %1359 = vmatprep.subr.bf16.mxu0 %v1560_v1  ;;  %1434 = vmatprep.subr.bf16.mxu1 %v1560_v1 }
 0x152   :  { %1361 = vmatpush3.bf16.msra.mxu0 %v1360_v38  ;;  %1436 = vmatpush3.bf16.msk.msra.mxu1 %vm2196_vm13, %v1563_v16 }
 0x153   :  { %1362 = vmatprep.subr.bf16.mxu0 %v1560_v1  ;;  %1437 = vmatprep.subr.bf16.mxu1 %v1560_v1 }
 0x156   :  { %1364 = vmatpush3.bf16.msra.mxu0 %v1363_v44  ;;  %1439 = vmatpush3.bf16.msk.msra.mxu1 %vm2197_vm14, %v1563_v16 }
 0x157   :  { %1365 = vmatprep.subr.bf16.mxu0 %v1560_v1  ;;  %1440 = vmatprep.subr.bf16.mxu1 %v1560_v1 }
 0x15a   :  { %1367 = vmatpush3.bf16.msra.mxu0 %v1366_v51  ;;  %1442 = vmatpush3.bf16.msk.msra.mxu1 %vm2198_vm15, %v1563_v16 }
 0x15b   :  { %1368 = vmatprep.subr.bf16.mxu0 %v1560_v1  ;;  %1443 = vmatprep.subr.bf16.mxu1 %v1560_v1 }
 0x15e   :  { %1370 = vmatpush3.bf16.msra.mxu0 %v1369_v9  ;;  %1445 = vmatpush3.bf16.msk.msra.mxu1 %vm1872_vm9, %v1563_v16 }
 0x15f   :  { %1371 = vmatprep.subr.bf16.mxu0 %v1560_v1 }
 0x161   :  { %1294 = vmatmul.mubr.f32.vlgmr.msra.gmra.mrb[0].mxu1 %v2015_v10 }
 0x162   :  { %1373 = vmatpush3.bf16.msra.mxu0 %v1372_v54 }
 0x165   :  { %1189 = vmatmul.mubr.f32.vlgmr.msra.gmra.mrb[2].mxu0 %v2018_v11 }
 0x234   :  { %v872_v4 = vpop.f32.mrb[0].mxu1 }
 0x235   :  { %v1295_v24 = vpop.f32.mrb[1].mxu1 }
 0x238   :  { %v577_v26 = vpop.f32.mrb[2].mxu0 }
 0x239   :  { %v1446_v34 = vadd.f32 %v872_v4, %v577_v26  ;;  %v1190_v41 = vpop.f32.mrb[3].mxu0 }
 0x23b   :  { %v876_v46 = vsub.f32 0.0, %v1446_v34 }
 0x23d   :  { %877 = vst.msk [vmem:[#allocation8] sm:$0xff] %vm2199_vm1, %v876_v46 }
 0x23e   :  { %1540 = shalt.err (!%p1537_p0)
}
 0x23f   :  { %s1541_s24 = scalar_lea.hbm %s2136_s3, 128 }
 0x240   :  { %p1542_p1 = scmp.ne.s32.totalorder %s2136_s3, %s1541_s24  ;;  %p1545_p2 = scmp.lt.u32.totalorder %s1541_s24, %s2136_s3 }
 0x242   :  { %p1547_p3 = pnand %p1545_p2, %p1542_p1 }
 0x244   :  { %1550 = shalt.err (!%p1547_p3)
}
 0x245   :  { %887 = dma.vmem_to_hbm [thread:$0]  %s885_s20, 128, %s2136_s3, [#allocation4]  }
 0x246   :  { %1555 = dma.done.wait [#allocation4], 128  }
 0x247   :  { %1556 = vsyncadd [#allocation4], 4294967168 }
 0x248   :  { %891 = vsyncpa [#allocation3], 1 }
 0x249   :  { %892 = vsyncpa [#allocation6], 1 }
 0x24a   :  { %893 = vsyncpa [#allocation4], 1 }

</bundles_post_ra>
